<compile_context>
chip_gen: v5e
topology: v5e:2x2
jax: 0.10.0
libtpu: 0.0.40
codegen_flags: <defaults>
</compile_context>

<pallas_src>
import functools

import jax
import jax.numpy as jnp
from jax.experimental import pallas as pl
from jax.experimental.pallas import tpu as pltpu

D_TEXT = 1024    # roberta-large hidden_size
D_IMG = 768      # deit-base hidden_size
HID = 256        # self.hid_dim
N_CLS = 2        # W / W_domain output dim
HEAD_PAD = 128   # fused head padded to one full lane width (disamb=cols 0:2, domain=cols 2:4)

# TODO(synk): the RoBERTa / DeiT transformer backbones, the text2visual_attn /
# MultiheadAttention path (unused in forward), and the data-dependent
# "object_features.shape[-1] == 1 -> zeros" branch are not translated; the
# kernel consumes backbone outputs directly and assumes a static, valid object
# count shared by all batch items.


def basemodel_head_kernel(tcls_ref, obj_ref, wt_ref, wv_ref, b_ref, out_ref, *, n_obj):
    """logits = t_cls @ Wt' + (sum_j obj_j) @ Wv' + b'   (heads + 1/N already folded)."""
    # Text CLS projection straight to the fused 128-lane head.
    logits = jnp.dot(tcls_ref[...], wt_ref[...], preferred_element_type=jnp.float32)

    # Object reduction: N static, lane-aligned (multiple-of-128 offsets) slice
    # adds on the flattened (b, N*D_IMG) block -- sublanes stay fully packed.
    obj = obj_ref[...]
    obj_sum = obj[:, 0:D_IMG]
    for j in range(1, n_obj):
        obj_sum = obj_sum + obj[:, j * D_IMG:(j + 1) * D_IMG]

    logits = logits + jnp.dot(obj_sum, wv_ref[...], preferred_element_type=jnp.float32)
    out_ref[...] = (logits + b_ref[...]).astype(out_ref.dtype)


def prepare_params(params, n_obj):
    """One-time parameter preparation (hoisted out of the per-forward path).

    Folds the 1/N object mean into the visual projection, and folds the padded
    [W | W_domain] head into both projection weights and a single fused bias.
    Exact f32 (composition done at HIGHEST precision).
    """
    wt, bt, wv, bv, ww, bw, wd, bd = params
    w_head = jnp.zeros((HID, HEAD_PAD), jnp.float32)
    w_head = w_head.at[:, 0:N_CLS].set(ww).at[:, N_CLS:2 * N_CLS].set(wd)
    b_head = jnp.zeros((1, HEAD_PAD), jnp.float32)
    b_head = b_head.at[:, 0:N_CLS].set(bw).at[:, N_CLS:2 * N_CLS].set(bd)

    hp = jax.lax.Precision.HIGHEST
    wt_f = jnp.dot(wt, w_head, precision=hp)                        # (D_TEXT, 128)
    wv_f = jnp.dot(wv * (1.0 / n_obj), w_head, precision=hp)        # (D_IMG, 128)
    b_f = jnp.dot(bt + bv, w_head, precision=hp) + b_head           # (1, 128)
    return wt_f, wv_f, b_f


def _pick_b_tile(B):
    """Generation-aware batch-tile policy:
       - v5e/v6e (single TensorCore): largest multiple-of-8 tile (fewest
         ~0.35us grid steps), capped so double-buffered f32 activations stay
         well inside the 32 MiB scoped-VMEM default,
       - v7x (2 TensorCores): at least 2 tiles per core so the 'parallel'
         batch axis can actually shard across cores."""
    if B <= 8 or B % 8 != 0:
        return B                               # tiny / ragged batch: one tile
    max_tile = 512                             # ~9 MiB double-buffered activations
    num_cores = getattr(jax.devices()[0], "num_cores", 1) or 1
    if num_cores > 1 and B >= 16:
        max_tile = min(max_tile, max(8, (B // (2 * num_cores)) // 8 * 8))
    t = min(B, max_tile)
    while B % t:
        t -= 8
    return t


def basemodel_head(text_hidden, obj_cls, fused_params):
    """Pallas head: consumes backbone outputs + prepare_params() output."""
    B, L, dt = text_hidden.shape
    _, n_obj, di = obj_cls.shape
    assert dt == D_TEXT and di == D_IMG
    wt_f, wv_f, b_f = fused_params

    # Free row-major reshapes (no copies). Flattening text lets a plain 2D
    # BlockSpec DMA *only* the CLS row (columns [0:D_TEXT] of each flattened
    # row); flattening objects keeps the block 2D and lane-dense.
    text_flat = text_hidden.reshape(B, L * D_TEXT)
    obj_flat = obj_cls.reshape(B, n_obj * D_IMG)

    b_tile = _pick_b_tile(B)
    grid = (B // b_tile,)

    const = lambda shape: pl.BlockSpec(shape, lambda i: (0, 0))
    # NOTE: grid-invariant params total ~0.9 MiB after the head fold, so the
    # default double-buffering costs <2 MiB of VMEM; kept as-is (no need to
    # force single buffering for headroom).

    kernel = functools.partial(basemodel_head_kernel, n_obj=n_obj)

    fused = pl.pallas_call(
        kernel,
        out_shape=jax.ShapeDtypeStruct((B, HEAD_PAD), jnp.float32),
        grid=grid,
        in_specs=[
            pl.BlockSpec((b_tile, D_TEXT), lambda i: (i, 0)),          # CLS rows only
            pl.BlockSpec((b_tile, n_obj * D_IMG), lambda i: (i, 0)),   # flat objects
            const((D_TEXT, HEAD_PAD)),
            const((D_IMG, HEAD_PAD)),
            const((1, HEAD_PAD)),
        ],
        out_specs=pl.BlockSpec((b_tile, HEAD_PAD), lambda i: (i, 0)),
        compiler_params=pltpu.CompilerParams(
            dimension_semantics=("parallel",)),
    )(text_flat, obj_flat, wt_f, wv_f, b_f)

    disamb_logit = fused[:, 0:N_CLS]
    domain_logit = fused[:, N_CLS:2 * N_CLS]
    return disamb_logit, domain_logit


def init_params(key):
    ks = jax.random.split(key, 8)
    s = 0.02
    wt = jax.random.normal(ks[0], (D_TEXT, HID), jnp.float32) * s
    bt = jax.random.normal(ks[1], (1, HID), jnp.float32) * s
    wv = jax.random.normal(ks[2], (D_IMG, HID), jnp.float32) * s
    bv = jax.random.normal(ks[3], (1, HID), jnp.float32) * s
    ww = jax.random.normal(ks[4], (HID, N_CLS), jnp.float32) * s
    bw = jax.random.normal(ks[5], (1, N_CLS), jnp.float32) * s
    wd = jax.random.normal(ks[6], (HID, N_CLS), jnp.float32) * s
    bd = jax.random.normal(ks[7], (1, N_CLS), jnp.float32) * s
    return (wt, bt, wv, bv, ww, bw, wd, bd)


def reference_head(text_hidden, obj_cls, params):
    # Mirrors the original torch forward (full-sequence projection then CLS
    # slice), evaluated at HIGHEST precision so it is an ~exact f32 reference.
    wt, bt, wv, bv, ww, bw, wd, bd = params
    hp = jax.lax.Precision.HIGHEST
    t_h = jnp.einsum('bld,dh->blh', text_hidden, wt, precision=hp) + bt
    obj_h = jnp.dot(jnp.mean(obj_cls, axis=1), wv, precision=hp) + bv
    final_h = t_h[:, 0, :] + obj_h
    disamb = jnp.dot(final_h, ww, precision=hp) + bw
    domain = jnp.dot(final_h, wd, precision=hp) + bd
    return disamb, domain


if __name__ == "__main__":
    key = jax.random.PRNGKey(0)
    k_text, k_obj, k_params = jax.random.split(key, 3)

    B, L, N_OBJ = 2, 8, 3
    text_hidden = jax.random.normal(k_text, (B, L, D_TEXT), jnp.float32)
    obj_cls = jax.random.normal(k_obj, (B, N_OBJ, D_IMG), jnp.float32)
    params = init_params(k_params)

    # One-time parameter preparation (head + 1/N folding), hoisted out of the
    # per-call path.
    fused_params = jax.block_until_ready(prepare_params(params, N_OBJ))

    forward = jax.jit(basemodel_head)
    disamb_logit, domain_logit = forward(text_hidden, obj_cls, fused_params)
    jax.block_until_ready((disamb_logit, domain_logit))

    ref_disamb, ref_domain = reference_head(text_hidden, obj_cls, params)
    assert disamb_logit.shape == (B, N_CLS) and domain_logit.shape == (B, N_CLS)
    # Head folding re-associates f32 matmuls; error is O(1e-6) on these scales,
    # keep a small safety margin over the exact-f32 reference.
    assert jnp.allclose(disamb_logit, ref_disamb, atol=5e-4, rtol=5e-4)
    assert jnp.allclose(domain_logit, ref_domain, atol=5e-4, rtol=5e-4)

    print("KERNEL_OK")
</pallas_src>

<mosaic_0001>
module attributes {stable_mosaic.version = 11 : i64} {
  func.func @basemodel_head_kernel(%arg0: i32, %arg1: memref<2x1024xf32, #tpu.memory_space<vmem>>, %arg2: memref<2x2304xf32, #tpu.memory_space<vmem>>, %arg3: memref<1024x128xf32, #tpu.memory_space<vmem>>, %arg4: memref<768x128xf32, #tpu.memory_space<vmem>>, %arg5: memref<1x128xf32, #tpu.memory_space<vmem>>, %arg6: memref<2x128xf32, #tpu.memory_space<vmem>>) attributes {dimension_semantics = [#tpu.dimension_semantics<parallel>], iteration_bounds = array<i64: 1>, scalar_prefetch = 0 : i64, scratch_operands = 0 : i64, tpu.core_type = #tpu.core_type<tc>, window_params = [{transform_indices = @transform_0, window_bounds = array<i64: 2, 1024>}, {transform_indices = @transform_1, window_bounds = array<i64: 2, 2304>}, {pipeline_mode = #tpu.pipeline_mode<synchronous>, transform_indices = @transform_2, window_bounds = array<i64: 1024, 128>}, {pipeline_mode = #tpu.pipeline_mode<synchronous>, transform_indices = @transform_3, window_bounds = array<i64: 768, 128>}, {pipeline_mode = #tpu.pipeline_mode<synchronous>, transform_indices = @transform_4, window_bounds = array<i64: 1, 128>}, {transform_indices = @transform_5, window_bounds = array<i64: 2, 128>}]} {
    %c0 = arith.constant 0 : index
    %c0_0 = arith.constant 0 : index
    %0 = vector.load %arg1[%c0, %c0_0] : memref<2x1024xf32, #tpu.memory_space<vmem>>, vector<2x1024xf32>
    %c0_1 = arith.constant 0 : index
    %c0_2 = arith.constant 0 : index
    %1 = vector.load %arg3[%c0_1, %c0_2] : memref<1024x128xf32, #tpu.memory_space<vmem>>, vector<1024x128xf32>
    %cst = arith.constant dense<0.000000e+00> : vector<2x128xf32>
    %2 = tpu.matmul %0, %1, %cst {dimension_numbers = #tpu.dot_dimension_numbers<[1], [0], [0], [1], [0, 0, 1, 1], [], []>} : vector<2x1024xf32>, vector<1024x128xf32>, vector<2x128xf32> -> vector<2x128xf32>
    %c0_3 = arith.constant 0 : index
    %c0_4 = arith.constant 0 : index
    %3 = vector.load %arg2[%c0_3, %c0_4] : memref<2x2304xf32, #tpu.memory_space<vmem>>, vector<2x2304xf32>
    %4 = vector.extract_strided_slice %3 {offsets = [0, 0], sizes = [2, 768], strides = [1, 1]} : vector<2x2304xf32> to vector<2x768xf32>
    %5 = vector.extract_strided_slice %3 {offsets = [0, 768], sizes = [2, 768], strides = [1, 1]} : vector<2x2304xf32> to vector<2x768xf32>
    %6 = arith.addf %4, %5 : vector<2x768xf32>
    %7 = vector.extract_strided_slice %3 {offsets = [0, 1536], sizes = [2, 768], strides = [1, 1]} : vector<2x2304xf32> to vector<2x768xf32>
    %8 = arith.addf %6, %7 : vector<2x768xf32>
    %c0_5 = arith.constant 0 : index
    %c0_6 = arith.constant 0 : index
    %9 = vector.load %arg4[%c0_5, %c0_6] : memref<768x128xf32, #tpu.memory_space<vmem>>, vector<768x128xf32>
    %cst_7 = arith.constant dense<0.000000e+00> : vector<2x128xf32>
    %10 = tpu.matmul %8, %9, %cst_7 {dimension_numbers = #tpu.dot_dimension_numbers<[1], [0], [0], [1], [0, 0, 1, 1], [], []>} : vector<2x768xf32>, vector<768x128xf32>, vector<2x128xf32> -> vector<2x128xf32>
    %11 = arith.addf %2, %10 : vector<2x128xf32>
    %c0_8 = arith.constant 0 : index
    %c0_9 = arith.constant 0 : index
    %12 = vector.load %arg5[%c0_8, %c0_9] : memref<1x128xf32, #tpu.memory_space<vmem>>, vector<1x128xf32>
    %13 = vector.broadcast %12 : vector<1x128xf32> to vector<2x128xf32>
    %14 = arith.addf %11, %13 : vector<2x128xf32>
    %c0_10 = arith.constant 0 : index
    %c0_11 = arith.constant 0 : index
    %15 = vector.load %arg6[%c0_10, %c0_11] : memref<2x128xf32, #tpu.memory_space<vmem>>, vector<2x128xf32>
    tpu.vector_store %arg6[%c0_10, %c0_11], %14 {strides = array<i32>} : memref<2x128xf32, #tpu.memory_space<vmem>>, vector<2x128xf32>,
    return
  }
  func.func @transform_0(%arg0: i32) -> (i32, i32) {
    %c0_i32 = arith.constant 0 : i32
    %c0_i32_0 = arith.constant 0 : i32
    return %arg0, %c0_i32 : i32, i32
  }
  func.func @transform_1(%arg0: i32) -> (i32, i32) {
    %c0_i32 = arith.constant 0 : i32
    %c0_i32_0 = arith.constant 0 : i32
    return %arg0, %c0_i32 : i32, i32
  }
  func.func @transform_2(%arg0: i32) -> (i32, i32) {
    %c0_i32 = arith.constant 0 : i32
    %c0_i32_0 = arith.constant 0 : i32
    %c0_i32_1 = arith.constant 0 : i32
    return %c0_i32, %c0_i32_0 : i32, i32
  }
  func.func @transform_3(%arg0: i32) -> (i32, i32) {
    %c0_i32 = arith.constant 0 : i32
    %c0_i32_0 = arith.constant 0 : i32
    %c0_i32_1 = arith.constant 0 : i32
    return %c0_i32, %c0_i32_0 : i32, i32
  }
  func.func @transform_4(%arg0: i32) -> (i32, i32) {
    %c0_i32 = arith.constant 0 : i32
    %c0_i32_0 = arith.constant 0 : i32
    %c0_i32_1 = arith.constant 0 : i32
    return %c0_i32, %c0_i32_0 : i32, i32
  }
  func.func @transform_5(%arg0: i32) -> (i32, i32) {
    %c0_i32 = arith.constant 0 : i32
    %c0_i32_0 = arith.constant 0 : i32
    return %arg0, %c0_i32 : i32, i32
  }
}

</mosaic_0001>

<bundles_post_ra>
// kernel: basemodel_head.1
= control target key start
LH: loop header
LB: loop body
LE: loop exit
PB: predicated region body
PF: predicated region fallthrough
CT: control target
= control target key end

     0   :  { %10 = vsyncpa [#allocation3], 0  ;;  %s750_s0 = inlined_call_operand.vmem [shape: f32[2,8192], index: 0, kind: input, shape index: {}]   ;;  %s751_s1 = inlined_call_operand.vmem [shape: f32[2,2304], index: 1, kind: input, shape index: {}]   ;;  %s752_s2 = inlined_call_operand.hbm [shape: f32[1024,128], index: 2, kind: input, shape index: {}]   ;;  %s753_s3 = inlined_call_operand.hbm [shape: f32[768,128], index: 3, kind: input, shape index: {}]   ;;  %s754_s4 = inlined_call_operand.vmem [shape: f32[1,128], index: 4, kind: input, shape index: {}]   ;;  %s755_s5 = inlined_call_operand.vmem [shape: f32[2,128], index: 5, kind: output, shape index: {}]  }
   0x1   :  { %s20_s20 = sshll.u32 %s752_s2, 4  ;;  %s21_s20 = int_to_ptr.hbm [resolvable:$true] %s20_s20 }
   0x2   :  { %11 = vsyncpa [#allocation5], 0  ;;  %s682_s21 = smov [#allocation2]   ;;  %s33_s25 = sshll.u32 %s753_s3, 4  ;;  %s34_s25 = int_to_ptr.hbm [resolvable:$true] %s33_s25 }
   0x3   :  { %s22_s22 = sshll.u32 %s682_s21, 4  ;;  %s683_s26 = smov 128   ;;  %s23_s22 = int_to_ptr.vmem [resolvable:$true] %s22_s22 }
   0x4   :  { %s684_s27 = smov 8   ;;  %s685_s28 = smov [#allocation4]  }
   0x5   :  { %28 = dma.hbm_to_vmem [thread:$0]  %s21_s20, 16384, %s23_s22, [#allocation3], %s683_s26, %s683_s26, %s684_s27  }
   0x6   :  { %s35_s29 = sshll.u32 %s685_s28, 4  ;;  %s36_s29 = int_to_ptr.vmem [resolvable:$true] %s35_s29 }
   0x7   :  { %41 = dma.hbm_to_vmem [thread:$0]  %s34_s25, 12288, %s36_s29, [#allocation5], %s683_s26, %s683_s26, %s684_s27  }
   0x8   :  { %678 = dma.done.wait [#allocation3], 16384  }
   0x9   :  { %679 = vsyncadd [#allocation3], 4294950912 }
   0xa   :  { %680 = dma.done.wait [#allocation5], 12288  }
   0xb   :  { %681 = vsyncadd [#allocation5], 4294955008  ;;  %v214_v0 = vld [vmem:[#allocation4 + $0x78] sm:$0xff]  ;;  %v213_v2 = vld [vmem:[#allocation4 + $0x70] sm:$0xff]  ;;  %vm191_vm0 = vcmask 1043456  }
   0xc   :  { %v246_v1 = vld [vmem:[#allocation4 + $0x178] sm:$0xff]  ;;  %312 = vmatpush.msra.mxu0 %v214_v0  ;;  %v245_v4 = vld [vmem:[#allocation4 + $0x170] sm:$0xff]  ;;  %v212_v6 = vld [vmem:[#allocation4 + $0x68] sm:$0xff] }
   0xd   :  { %352 = vmatpush.msra.mxu2 %v246_v1  ;;  %v230_v3 = vld [vmem:[#allocation4 + $0xf8] sm:$0xff]  ;;  %v229_v7 = vld [vmem:[#allocation4 + $0xf0] sm:$0xff]  ;;  %v244_v8 = vld [vmem:[#allocation4 + $0x168] sm:$0xff] }
   0xe   :  { %v262_v5 = vld [vmem:[#allocation4 + $0x1f8] sm:$0xff]  ;;  %332 = vmatpush.msra.mxu1 %v230_v3  ;;  %313 = vmatpush.msra.mxu0 %v213_v2  ;;  %v261_v9 = vld [vmem:[#allocation4 + $0x1f0] sm:$0xff]  ;;  %v228_v10 = vld [vmem:[#allocation4 + $0xe8] sm:$0xff] }
   0xf   :  { %372 = vmatpush.msra.mxu3 %v262_v5  ;;  %353 = vmatpush.msra.mxu2 %v245_v4  ;;  %v211_v11 = vld [vmem:[#allocation4 + $0x60] sm:$0xff]  ;;  %v260_v13 = vld [vmem:[#allocation4 + $0x1e8] sm:$0xff]  ;;  %v210_v16 = vld [vmem:[#allocation4 + $0x58] sm:$0xff] }
  0x10   :  { %333 = vmatpush.msra.mxu1 %v229_v7  ;;  %v243_v12 = vld [vmem:[#allocation4 + $0x160] sm:$0xff]  ;;  %314 = vmatpush.msra.mxu0 %v212_v6  ;;  %v242_v17 = vld [vmem:[#allocation4 + $0x158] sm:$0xff]  ;;  %v209_v20 = vld [vmem:[#allocation4 + $0x50] sm:$0xff] }
  0x11   :  { %373 = vmatpush.msra.mxu3 %v261_v9  ;;  %354 = vmatpush.msra.mxu2 %v244_v8  ;;  %v227_v14 = vld [vmem:[#allocation4 + $0xe0] sm:$0xff]  ;;  %v226_v18 = vld [vmem:[#allocation4 + $0xd8] sm:$0xff]  ;;  %v241_v21 = vld [vmem:[#allocation4 + $0x150] sm:$0xff] }
  0x12   :  { %v259_v15 = vld [vmem:[#allocation4 + $0x1e0] sm:$0xff]  ;;  %334 = vmatpush.msra.mxu1 %v228_v10  ;;  %315 = vmatpush.msra.mxu0 %v211_v11  ;;  %v258_v19 = vld [vmem:[#allocation4 + $0x1d8] sm:$0xff]  ;;  %v225_v22 = vld [vmem:[#allocation4 + $0xd0] sm:$0xff] }
  0x13   :  { %374 = vmatpush.msra.mxu3 %v260_v13  ;;  %355 = vmatpush.msra.mxu2 %v243_v12  ;;  %v257_v23 = vld [vmem:[#allocation4 + $0x1d0] sm:$0xff]  ;;  %v208_v24 = vld [vmem:[#allocation4 + $0x48] sm:$0xff]  ;;  %v207_v28 = vld [vmem:[#allocation4 + $0x40] sm:$0xff] }
  0x14   :  { %335 = vmatpush.msra.mxu1 %v227_v14  ;;  %316 = vmatpush.msra.mxu0 %v210_v16  ;;  %v240_v25 = vld [vmem:[#allocation4 + $0x148] sm:$0xff]  ;;  %v239_v29 = vld [vmem:[#allocation4 + $0x140] sm:$0xff]  ;;  %v206_v32 = vld [vmem:[#allocation4 + $0x38] sm:$0xff] }
  0x15   :  { %375 = vmatpush.msra.mxu3 %v259_v15  ;;  %356 = vmatpush.msra.mxu2 %v242_v17  ;;  %v224_v26 = vld [vmem:[#allocation4 + $0xc8] sm:$0xff]  ;;  %v223_v30 = vld [vmem:[#allocation4 + $0xc0] sm:$0xff]  ;;  %v238_v33 = vld [vmem:[#allocation4 + $0x138] sm:$0xff] }
  0x16   :  { %336 = vmatpush.msra.mxu1 %v226_v18  ;;  %317 = vmatpush.msra.mxu0 %v209_v20  ;;  %v256_v27 = vld [vmem:[#allocation4 + $0x1c8] sm:$0xff]  ;;  %v255_v31 = vld [vmem:[#allocation4 + $0x1c0] sm:$0xff]  ;;  %v222_v34 = vld [vmem:[#allocation4 + $0xb8] sm:$0xff] }
  0x17   :  { %376 = vmatpush.msra.mxu3 %v258_v19  ;;  %357 = vmatpush.msra.mxu2 %v241_v21  ;;  %v254_v35 = vld [vmem:[#allocation4 + $0x1b8] sm:$0xff]  ;;  %v205_v36 = vld [vmem:[#allocation4 + $0x30] sm:$0xff]  ;;  %v204_v40 = vld [vmem:[#allocation4 + $0x28] sm:$0xff] }
  0x18   :  { %337 = vmatpush.msra.mxu1 %v225_v22  ;;  %318 = vmatpush.msra.mxu0 %v208_v24  ;;  %v237_v37 = vld [vmem:[#allocation4 + $0x130] sm:$0xff]  ;;  %v236_v41 = vld [vmem:[#allocation4 + $0x128] sm:$0xff]  ;;  %v203_v44 = vld [vmem:[#allocation4 + $0x20] sm:$0xff] }
  0x19   :  { %377 = vmatpush.msra.mxu3 %v257_v23  ;;  %358 = vmatpush.msra.mxu2 %v240_v25  ;;  %v221_v38 = vld [vmem:[#allocation4 + $0xb0] sm:$0xff]  ;;  %v220_v42 = vld [vmem:[#allocation4 + $0xa8] sm:$0xff]  ;;  %v235_v45 = vld [vmem:[#allocation4 + $0x120] sm:$0xff] }
  0x1a   :  { %338 = vmatpush.msra.mxu1 %v224_v26  ;;  %319 = vmatpush.msra.mxu0 %v207_v28  ;;  %v253_v39 = vld [vmem:[#allocation4 + $0x1b0] sm:$0xff]  ;;  %v252_v43 = vld [vmem:[#allocation4 + $0x1a8] sm:$0xff]  ;;  %v219_v46 = vld [vmem:[#allocation4 + $0xa0] sm:$0xff] }
  0x1b   :  { %378 = vmatpush.msra.mxu3 %v256_v27  ;;  %359 = vmatpush.msra.mxu2 %v239_v29  ;;  %v251_v47 = vld [vmem:[#allocation4 + $0x1a0] sm:$0xff]  ;;  %v202_v48 = vld [vmem:[#allocation4 + $0x18] sm:$0xff]  ;;  %v201_v52 = vld [vmem:[#allocation4 + $0x10] sm:$0xff] }
  0x1c   :  { %339 = vmatpush.msra.mxu1 %v223_v30  ;;  %320 = vmatpush.msra.mxu0 %v206_v32  ;;  %v234_v49 = vld [vmem:[#allocation4 + $0x118] sm:$0xff]  ;;  %v233_v53 = vld [vmem:[#allocation4 + $0x110] sm:$0xff]  ;;  %v200_v56 = vld [vmem:[#allocation4 + $0x8] sm:$0xff] }
  0x1d   :  { %379 = vmatpush.msra.mxu3 %v255_v31  ;;  %360 = vmatpush.msra.mxu2 %v238_v33  ;;  %v218_v50 = vld [vmem:[#allocation4 + $0x98] sm:$0xff]  ;;  %v217_v54 = vld [vmem:[#allocation4 + $0x90] sm:$0xff]  ;;  %v232_v57 = vld [vmem:[#allocation4 + $0x108] sm:$0xff] }
  0x1e   :  { %340 = vmatpush.msra.mxu1 %v222_v34  ;;  %321 = vmatpush.msra.mxu0 %v205_v36  ;;  %v250_v51 = vld [vmem:[#allocation4 + $0x198] sm:$0xff]  ;;  %v249_v55 = vld [vmem:[#allocation4 + $0x190] sm:$0xff]  ;;  %v216_v58 = vld [vmem:[#allocation4 + $0x88] sm:$0xff] }
  0x1f   :  { %380 = vmatpush.msra.mxu3 %v254_v35  ;;  %361 = vmatpush.msra.mxu2 %v237_v37  ;;  %v248_v59 = vld [vmem:[#allocation4 + $0x188] sm:$0xff]  ;;  %v199_v60 = vld [vmem:[#allocation4] sm:$0xff]  ;;  %v278_v62 = vld [vmem:[#allocation4 + $0x278] sm:$0xff] }
  0x20   :  { %341 = vmatpush.msra.mxu1 %v221_v38  ;;  %322 = vmatpush.msra.mxu0 %v204_v40  ;;  %v231_v61 = vld [vmem:[#allocation4 + $0x100] sm:$0xff]  ;;  %v69_v63 = vld [vmem:[#allocation2 + $0x78] sm:$0xff]  ;;  %v277_v2 = vld [vmem:[#allocation4 + $0x270] sm:$0xff] }
  0x21   :  { %381 = vmatpush.msra.mxu3 %v253_v39  ;;  %362 = vmatpush.msra.mxu2 %v236_v41  ;;  %v215_v0 = vld [vmem:[#allocation4 + $0x80] sm:$0xff]  ;;  %v294_v3 = vld [vmem:[#allocation4 + $0x2f8] sm:$0xff]  ;;  %v68_v4 = vld [vmem:[#allocation2 + $0x70] sm:$0xff] }
  0x22   :  { %342 = vmatpush.msra.mxu1 %v220_v42  ;;  %323 = vmatpush.msra.mxu0 %v203_v44  ;;  %v247_v1 = vld [vmem:[#allocation4 + $0x180] sm:$0xff]  ;;  %v85_v5 = vld [vmem:[#allocation2 + $0xf8] sm:$0xff]  ;;  %v276_v6 = vld [vmem:[#allocation4 + $0x268] sm:$0xff] }
  0x23   :  { %382 = vmatpush.msra.mxu3 %v252_v43  ;;  %363 = vmatpush.msra.mxu2 %v235_v45  ;;  %v293_v7 = vld [vmem:[#allocation4 + $0x2f0] sm:$0xff]  ;;  %v67_v8 = vld [vmem:[#allocation2 + $0x68] sm:$0xff]  ;;  %v275_v10 = vld [vmem:[#allocation4 + $0x260] sm:$0xff] }
  0x24   :  { %343 = vmatpush.msra.mxu1 %v219_v46  ;;  %324 = vmatpush.msra.mxu0 %v202_v48  ;;  %v84_v9 = vld [vmem:[#allocation2 + $0xf0] sm:$0xff]  ;;  %v292_v11 = vld [vmem:[#allocation4 + $0x2e8] sm:$0xff]  ;;  %v66_v12 = vld [vmem:[#allocation2 + $0x60] sm:$0xff] }
  0x25   :  { %383 = vmatpush.msra.mxu3 %v251_v47  ;;  %364 = vmatpush.msra.mxu2 %v234_v49  ;;  %v83_v13 = vld [vmem:[#allocation2 + $0xe8] sm:$0xff]  ;;  %v274_v14 = vld [vmem:[#allocation4 + $0x258] sm:$0xff]  ;;  %v291_v15 = vld [vmem:[#allocation4 + $0x2e0] sm:$0xff] }
  0x26   :  { %344 = vmatpush.msra.mxu1 %v218_v50  ;;  %325 = vmatpush.msra.mxu0 %v201_v52  ;;  %v65_v16 = vld [vmem:[#allocation2 + $0x58] sm:$0xff]  ;;  %v82_v17 = vld [vmem:[#allocation2 + $0xe0] sm:$0xff]  ;;  %v273_v18 = vld [vmem:[#allocation4 + $0x250] sm:$0xff] }
  0x27   :  { %384 = vmatpush.msra.mxu3 %v250_v51  ;;  %365 = vmatpush.msra.mxu2 %v233_v53  ;;  %v290_v19 = vld [vmem:[#allocation4 + $0x2d8] sm:$0xff]  ;;  %v183_v20 = vld [vmem:[%s751_s1 + $0x8] sm:$0xff]  ;;  %v64_v21 = vld [vmem:[#allocation2 + $0x50] sm:$0xff] }
  0x28   :  { %345 = vmatpush.msra.mxu1 %v217_v54  ;;  %326 = vmatpush.msra.mxu0 %v200_v56  ;;  %v81_v22 = vld [vmem:[#allocation2 + $0xd8] sm:$0xff]  ;;  %v184_v23 = vld [vmem:[%s751_s1 + $0x10] sm:$0xff]  ;;  %v189_v24 = vrot.slane %v183_v20, 4  ;;  %v289_v26 = vld [vmem:[#allocation4 + $0x2d0] sm:$0xff] }
  0x29   :  { %385 = vmatpush.msra.mxu3 %v249_v55  ;;  %366 = vmatpush.msra.mxu2 %v232_v57  ;;  %v272_v25 = vld [vmem:[#allocation4 + $0x248] sm:$0xff]  ;;  %v182_v27 = vld [vmem:[%s751_s1] sm:$0xff]  ;;  %v190_v28 = vrot.slane %v184_v23, 4  ;;  %v80_v30 = vld [vmem:[#allocation2 + $0xd0] sm:$0xff] }
  0x2a   :  { %346 = vmatpush.msra.mxu1 %v216_v58  ;;  %327 = vmatpush.msra.mxu0 %v199_v60  ;;  %v63_v29 = vld [vmem:[#allocation2 + $0x48] sm:$0xff]  ;;  %v271_v31 = vld [vmem:[#allocation4 + $0x240] sm:$0xff]  ;;  %v185_v33 = vld [vmem:[%s751_s1 + $0x18] sm:$0xff] }
  0x2b   :  { %386 = vmatpush.msra.mxu3 %v248_v59  ;;  %367 = vmatpush.msra.mxu2 %v231_v61  ;;  %v288_v32 = vld [vmem:[#allocation4 + $0x2c8] sm:$0xff]  ;;  %v192_v34 = vsel %vm191_vm0, %v189_v24, %v190_v28  ;;  %v62_v35 = vld [vmem:[#allocation2 + $0x40] sm:$0xff]  ;;  %v196_v38 = vadd.f32 %v190_v28, %v183_v20  ;;  %v270_v39 = vld [vmem:[#allocation4 + $0x238] sm:$0xff] }
  0x2c   :  { %392 = vmatpush.msrb.mxu0 %v278_v62  ;;  %347 = vmatpush.msra.mxu1 %v215_v0  ;;  %v79_v36 = vld [vmem:[#allocation2 + $0xc8] sm:$0xff]  ;;  %v195_v37 = vadd.f32 %v192_v34, %v182_v27  ;;  %v287_v40 = vld [vmem:[#allocation4 + $0x2c0] sm:$0xff]  ;;  %v61_v41 = vld [vmem:[#allocation2 + $0x38] sm:$0xff] }
  0x2d   :  { %453 = vmatpush.msrb.mxu2 %v69_v63  ;;  %387 = vmatpush.msra.mxu3 %v247_v1  ;;  %v78_v42 = vld [vmem:[#allocation2 + $0xc0] sm:$0xff]  ;;  %v269_v44 = vld [vmem:[#allocation4 + $0x230] sm:$0xff]  ;;  %v286_v45 = vld [vmem:[#allocation4 + $0x2b8] sm:$0xff] }
  0x2e   :  { %393 = vmatpush.msrb.mxu0 %v277_v2  ;;  %412 = vmatpush.msrb.mxu1 %v294_v3  ;;  %v197_v43 = vadd.f32 %v195_v37, %v185_v33  ;;  %v186_v46 = vld [vmem:[%s751_s1 + $0x20] sm:$0xf]  ;;  %v60_v47 = vld [vmem:[#allocation2 + $0x30] sm:$0xff]  ;;  %v268_v50 = vld [vmem:[#allocation4 + $0x228] sm:$0xff] }
  0x2f   :  { %454 = vmatpush.msrb.mxu2 %v68_v4  ;;  %473 = vmatpush.msrb.mxu3 %v85_v5  ;;  %v77_v48 = vld [vmem:[#allocation2 + $0xb8] sm:$0xff]  ;;  %v198_v49 = vadd.f32 %v196_v38, %v186_v46  ;;  %v285_v51 = vld [vmem:[#allocation4 + $0x2b0] sm:$0xff]  ;;  %v59_v52 = vld [vmem:[#allocation2 + $0x28] sm:$0xff] }
  0x30   :  { %394 = vmatpush.msrb.mxu0 %v276_v6  ;;  %413 = vmatpush.msrb.mxu1 %v293_v7  ;;  %297 = vst [vmem:[#allocation1] ss:$4 sm:$0xff] %v197_v43  ;;  %v76_v53 = vld [vmem:[#allocation2 + $0xb0] sm:$0xff]  ;;  %v267_v54 = vld [vmem:[#allocation4 + $0x220] sm:$0xff]  ;;  %v284_v55 = vld [vmem:[#allocation4 + $0x2a8] sm:$0xff] }
  0x31   :  { %455 = vmatpush.msrb.mxu2 %v67_v8  ;;  %474 = vmatpush.msrb.mxu3 %v84_v9  ;;  %299 = vst [vmem:[#allocation1 + $0x20] ss:$4 sm:$0xff] %v198_v49  ;;  %v58_v56 = vld [vmem:[#allocation2 + $0x20] sm:$0xff]  ;;  %v75_v57 = vld [vmem:[#allocation2 + $0xa8] sm:$0xff]  ;;  %v266_v58 = vld [vmem:[#allocation4 + $0x218] sm:$0xff] }
  0x32   :  { %395 = vmatpush.msrb.mxu0 %v275_v10  ;;  %414 = vmatpush.msrb.mxu1 %v292_v11  ;;  %v283_v59 = vld [vmem:[#allocation4 + $0x2a0] sm:$0xff]  ;;  %v57_v60 = vld [vmem:[#allocation2 + $0x18] sm:$0xff]  ;;  %v265_v62 = vld [vmem:[#allocation4 + $0x210] sm:$0xff] }
  0x33   :  { %456 = vmatpush.msrb.mxu2 %v66_v12  ;;  %475 = vmatpush.msrb.mxu3 %v83_v13  ;;  %v74_v61 = vld [vmem:[#allocation2 + $0xa0] sm:$0xff]  ;;  %v282_v63 = vld [vmem:[#allocation4 + $0x298] sm:$0xff]  ;;  %v56_v0 = vld [vmem:[#allocation2 + $0x10] sm:$0xff] }
  0x34   :  { %396 = vmatpush.msrb.mxu0 %v274_v14  ;;  %415 = vmatpush.msrb.mxu1 %v291_v15  ;;  %v73_v1 = vld [vmem:[#allocation2 + $0x98] sm:$0xff]  ;;  %v53_v3 = vld [vmem:[%s750_s0 + $0x8] sm:$0xff]  ;;  %v264_v8 = vld [vmem:[#allocation4 + $0x208] sm:$0xff] }
  0x35   :  { %457 = vmatpush.msrb.mxu2 %v65_v16  ;;  %476 = vmatpush.msrb.mxu3 %v82_v17  ;;  %v52_v2 = vld [vmem:[%s750_s0] sm:$0xff]  ;;  %v281_v9 = vld [vmem:[#allocation4 + $0x290] sm:$0xff]  ;;  %v55_v10 = vld [vmem:[#allocation2 + $0x8] sm:$0xff] }
  0x36   :  { %397 = vmatpush.msrb.mxu0 %v273_v18  ;;  %416 = vmatpush.msrb.mxu1 %v290_v19  ;;  %v72_v13 = vld [vmem:[#allocation2 + $0x90] sm:$0xff]  ;;  %v263_v14 = vld [vmem:[#allocation4 + $0x200] sm:$0xff]  ;;  %v280_v15 = vld [vmem:[#allocation4 + $0x288] sm:$0xff] }
  0x37   :  { %458 = vmatpush.msrb.mxu2 %v64_v21  ;;  %477 = vmatpush.msrb.mxu3 %v81_v22  ;;  %v302_v4 = vld.sshfl [vmem:[#allocation1 + $0x10] sm:$0xff pattern:$0x73625140]  ;;  %v300_v5 = vld.sshfl [vmem:[#allocation1] sm:$0xff pattern:$0x73625140] }
  0x38   :  { %398 = vmatpush.msrb.mxu0 %v272_v25  ;;  %417 = vmatpush.msrb.mxu1 %v289_v26  ;;  %v303_v6 = vld.sshfl [vmem:[#allocation1 + $0x18] sm:$0xff pattern:$0x73625140]  ;;  %v301_v7 = vld.sshfl [vmem:[#allocation1 + $0x8] sm:$0xff pattern:$0x73625140] }
  0x39   :  { %459 = vmatpush.msrb.mxu2 %v63_v29  ;;  %478 = vmatpush.msrb.mxu3 %v80_v30  ;;  %434 = vst [vmem:[#allocation1] ss:$4 sm:$0xff] %v52_v2  ;;  %v304_v11 = vld.sshfl [vmem:[#allocation1 + $0x20] sm:$0xff pattern:$0x73625140]  ;;  %v54_v16 = vld [vmem:[#allocation2] sm:$0xff] }
  0x3a   :  { %399 = vmatpush.msrb.mxu0 %v271_v31  ;;  %418 = vmatpush.msrb.mxu1 %v288_v32  ;;  %v305_v12 = vld.sshfl [vmem:[#allocation1 + $0x28] sm:$0xff pattern:$0x73625140]  ;;  %v71_v17 = vld [vmem:[#allocation2 + $0x88] sm:$0xff]  ;;  %v101_v18 = vld [vmem:[#allocation2 + $0x178] sm:$0xff] }
  0x3b   :  { %460 = vmatpush.msrb.mxu2 %v62_v35  ;;  %479 = vmatpush.msrb.mxu3 %v79_v36  ;;  %436 = vst [vmem:[#allocation1 + $0x20] ss:$4 sm:$0xff] %v53_v3  ;;  %v133_v19 = vld [vmem:[#allocation2 + $0x278] sm:$0xff]  ;;  %v279_v20 = vld [vmem:[#allocation4 + $0x280] sm:$0xff]  ;;  %v100_v22 = vld [vmem:[#allocation2 + $0x170] sm:$0xff] }
  0x3c   :  { %400 = vmatpush.msrb.mxu0 %v270_v39  ;;  %419 = vmatpush.msrb.mxu1 %v287_v40  ;;  %v70_v21 = vld [vmem:[#allocation2 + $0x80] sm:$0xff]  ;;  %v117_v23 = vld [vmem:[#allocation2 + $0x1f8] sm:$0xff]  ;;  %v132_v24 = vld [vmem:[#allocation2 + $0x270] sm:$0xff] }
  0x3d   :  { %461 = vmatpush.msrb.mxu2 %v61_v41  ;;  %480 = vmatpush.msrb.mxu3 %v78_v42  ;;  %v149_v25 = vld [vmem:[#allocation2 + $0x2f8] sm:$0xff]  ;;  %v99_v27 = vld [vmem:[#allocation2 + $0x168] sm:$0xff]  ;;  %v116_v28 = vld [vmem:[#allocation2 + $0x1f0] sm:$0xff] }
  0x3e   :  { %401 = vmatpush.msrb.mxu0 %v269_v44  ;;  %420 = vmatpush.msrb.mxu1 %v286_v45  ;;  %v131_v29 = vld [vmem:[#allocation2 + $0x268] sm:$0xff]  ;;  %v148_v30 = vld [vmem:[#allocation2 + $0x2f0] sm:$0xff]  ;;  %v98_v32 = vld [vmem:[#allocation2 + $0x160] sm:$0xff] }
  0x3f   :  { %462 = vmatpush.msrb.mxu2 %v60_v47  ;;  %481 = vmatpush.msrb.mxu3 %v77_v48  ;;  %v115_v33 = vld [vmem:[#allocation2 + $0x1e8] sm:$0xff]  ;;  %v130_v34 = vld [vmem:[#allocation2 + $0x260] sm:$0xff]  ;;  %v97_v36 = vld [vmem:[#allocation2 + $0x158] sm:$0xff] }
  0x40   :  { %402 = vmatpush.msrb.mxu0 %v268_v50  ;;  %421 = vmatpush.msrb.mxu1 %v285_v51  ;;  %v437_v26 = vld.sshfl [vmem:[#allocation1] sm:$0xff pattern:$0x73625140]  ;;  %v438_v31 = vld.sshfl [vmem:[#allocation1 + $0x8] sm:$0xff pattern:$0x73625140] }
  0x41   :  { %463 = vmatpush.msrb.mxu2 %v59_v52  ;;  %482 = vmatpush.msrb.mxu3 %v76_v53  ;;  %v147_v35 = vld [vmem:[#allocation2 + $0x2e8] sm:$0xff]  ;;  %v114_v37 = vld [vmem:[#allocation2 + $0x1e0] sm:$0xff]  ;;  %v129_v38 = vld [vmem:[#allocation2 + $0x258] sm:$0xff] }
  0x42   :  { %403 = vmatpush.msrb.mxu0 %v267_v54  ;;  %422 = vmatpush.msrb.mxu1 %v284_v55  ;;  %v146_v39 = vld [vmem:[#allocation2 + $0x2e0] sm:$0xff]  ;;  %v96_v40 = vld [vmem:[#allocation2 + $0x150] sm:$0xff]  ;;  %v113_v41 = vld [vmem:[#allocation2 + $0x1d8] sm:$0xff] }
  0x43   :  { %464 = vmatpush.msrb.mxu2 %v58_v56  ;;  %483 = vmatpush.msrb.mxu3 %v75_v57  ;;  %v128_v42 = vld [vmem:[#allocation2 + $0x250] sm:$0xff]  ;;  %v145_v43 = vld [vmem:[#allocation2 + $0x2d8] sm:$0xff]  ;;  %v95_v44 = vld [vmem:[#allocation2 + $0x148] sm:$0xff] }
  0x44   :  { %404 = vmatpush.msrb.mxu0 %v266_v58  ;;  %423 = vmatpush.msrb.mxu1 %v283_v59  ;;  %v112_v45 = vld [vmem:[#allocation2 + $0x1d0] sm:$0xff]  ;;  %v127_v46 = vld [vmem:[#allocation2 + $0x248] sm:$0xff]  ;;  %v94_v48 = vld [vmem:[#allocation2 + $0x140] sm:$0xff] }
  0x45   :  { %465 = vmatpush.msrb.mxu2 %v57_v60  ;;  %484 = vmatpush.msrb.mxu3 %v74_v61  ;;  %v144_v47 = vld [vmem:[#allocation2 + $0x2d0] sm:$0xff]  ;;  %v111_v49 = vld [vmem:[#allocation2 + $0x1c8] sm:$0xff]  ;;  %v126_v50 = vld [vmem:[#allocation2 + $0x240] sm:$0xff] }
  0x46   :  { %405 = vmatpush.msrb.mxu0 %v265_v62  ;;  %424 = vmatpush.msrb.mxu1 %v282_v63  ;;  %v143_v51 = vld [vmem:[#allocation2 + $0x2c8] sm:$0xff]  ;;  %v93_v52 = vld [vmem:[#allocation2 + $0x138] sm:$0xff]  ;;  %v110_v53 = vld [vmem:[#allocation2 + $0x1c0] sm:$0xff] }
  0x47   :  { %466 = vmatpush.msrb.mxu2 %v56_v0  ;;  %485 = vmatpush.msrb.mxu3 %v73_v1  ;;  %v125_v54 = vld [vmem:[#allocation2 + $0x238] sm:$0xff]  ;;  %v142_v55 = vld [vmem:[#allocation2 + $0x2c0] sm:$0xff]  ;;  %v92_v56 = vld [vmem:[#allocation2 + $0x130] sm:$0xff] }
  0x48   :  { %368 = vmatmul.f32.vlgmr.msra.gmra.mxu2 %v302_v4  ;;  %406 = vmatpush.msrb.mxu0 %v264_v8  ;;  %v109_v57 = vld [vmem:[#allocation2 + $0x1b8] sm:$0xff]  ;;  %v124_v58 = vld [vmem:[#allocation2 + $0x230] sm:$0xff]  ;;  %v91_v60 = vld [vmem:[#allocation2 + $0x128] sm:$0xff] }
  0x49   :  { %425 = vmatpush.msrb.mxu1 %v281_v9  ;;  %467 = vmatpush.msrb.mxu2 %v55_v10  ;;  %v141_v59 = vld [vmem:[#allocation2 + $0x2b8] sm:$0xff]  ;;  %v108_v61 = vld [vmem:[#allocation2 + $0x1b0] sm:$0xff]  ;;  %v123_v62 = vld [vmem:[#allocation2 + $0x228] sm:$0xff] }
  0x4a   :  { %486 = vmatpush.msrb.mxu3 %v72_v13  ;;  %328 = vmatmul.f32.vlgmr.msra.gmra.mxu0 %v300_v5  ;;  %v140_v63 = vld [vmem:[#allocation2 + $0x2b0] sm:$0xff]  ;;  %v90_v0 = vld [vmem:[#allocation2 + $0x120] sm:$0xff]  ;;  %v107_v1 = vld [vmem:[#allocation2 + $0x1a8] sm:$0xff] }
  0x4b   :  { %388 = vmatmul.f32.vlgmr.msra.gmra.mxu3 %v303_v6  ;;  %407 = vmatpush.msrb.mxu0 %v263_v14  ;;  %v122_v2 = vld [vmem:[#allocation2 + $0x220] sm:$0xff]  ;;  %v139_v3 = vld [vmem:[#allocation2 + $0x2a8] sm:$0xff]  ;;  %v89_v4 = vld [vmem:[#allocation2 + $0x118] sm:$0xff] }
  0x4c   :  { %426 = vmatpush.msrb.mxu1 %v280_v15  ;;  %468 = vmatpush.msrb.mxu2 %v54_v16  ;;  %v106_v5 = vld [vmem:[#allocation2 + $0x1a0] sm:$0xff]  ;;  %v121_v6 = vld [vmem:[#allocation2 + $0x218] sm:$0xff]  ;;  %v88_v8 = vld [vmem:[#allocation2 + $0x110] sm:$0xff] }
  0x4d   :  { %487 = vmatpush.msrb.mxu3 %v71_v17  ;;  %348 = vmatmul.f32.vlgmr.msra.gmra.mxu1 %v301_v7  ;;  %v138_v7 = vld [vmem:[#allocation2 + $0x2a0] sm:$0xff]  ;;  %v105_v9 = vld [vmem:[#allocation2 + $0x198] sm:$0xff]  ;;  %v120_v10 = vld [vmem:[#allocation2 + $0x210] sm:$0xff] }
  0x4e   :  { %493 = vmatpush.msra.mxu0 %v101_v18  ;;  %533 = vmatpush.msra.mxu2 %v133_v19  ;;  %v104_v13 = vld [vmem:[#allocation2 + $0x190] sm:$0xff]  ;;  %v119_v14 = vld [vmem:[#allocation2 + $0x208] sm:$0xff]  ;;  %v86_v16 = vld [vmem:[#allocation2 + $0x100] sm:$0xff] }
  0x4f   :  { %427 = vmatpush.msrb.mxu1 %v279_v20  ;;  %488 = vmatpush.msrb.mxu3 %v70_v21  ;;  %v136_v15 = vld [vmem:[#allocation2 + $0x290] sm:$0xff]  ;;  %v103_v17 = vld [vmem:[#allocation2 + $0x188] sm:$0xff]  ;;  %v118_v18 = vld [vmem:[#allocation2 + $0x200] sm:$0xff] }
  0x50   :  { %494 = vmatpush.msra.mxu0 %v100_v22  ;;  %534 = vmatpush.msra.mxu2 %v132_v24  ;;  %v135_v19 = vld [vmem:[#allocation2 + $0x288] sm:$0xff]  ;;  %v441_v21 = vld.sshfl [vmem:[#allocation1 + $0x20] sm:$0xff pattern:$0x73625140]  ;;  %v134_v24 = vld [vmem:[#allocation2 + $0x280] sm:$0xff] }
  0x51   :  { %513 = vmatpush.msra.mxu1 %v117_v23  ;;  %553 = vmatpush.msra.mxu3 %v149_v25  ;;  %v439_v20 = vld.sshfl [vmem:[#allocation1 + $0x10] sm:$0xff pattern:$0x73625140]  ;;  %v165_v22 = vld [vmem:[#allocation2 + $0x378] sm:$0xff]  ;;  %v102_v23 = vld [vmem:[#allocation2 + $0x180] sm:$0xff] }
  0x52   :  { %469 = vmatmul.f32.vlgmr.msrb.gmra.mxu2 %v437_v26  ;;  %495 = vmatpush.msra.mxu0 %v99_v27  ;;  %v440_v25 = vld.sshfl [vmem:[#allocation1 + $0x18] sm:$0xff pattern:$0x73625140]  ;;  %v442_v26 = vld.sshfl [vmem:[#allocation1 + $0x28] sm:$0xff pattern:$0x73625140] }
  0x53   :  { %514 = vmatpush.msra.mxu1 %v116_v28  ;;  %535 = vmatpush.msra.mxu2 %v131_v29  ;;  %v164_v27 = vld [vmem:[#allocation2 + $0x370] sm:$0xff]  ;;  %v181_v28 = vld [vmem:[#allocation2 + $0x3f8] sm:$0xff]  ;;  %v163_v29 = vld [vmem:[#allocation2 + $0x368] sm:$0xff] }
  0x54   :  { %554 = vmatpush.msra.mxu3 %v148_v30  ;;  %408 = vmatmul.f32.vlgmr.msrb.gmra.mxu0 %v304_v11  ;;  %v137_v11 = vld [vmem:[#allocation2 + $0x298] sm:$0xff]  ;;  %v180_v30 = vld [vmem:[#allocation2 + $0x3f0] sm:$0xff] }
  0x55   :  { %489 = vmatmul.f32.vlgmr.msrb.gmra.mxu3 %v438_v31  ;;  %496 = vmatpush.msra.mxu0 %v98_v32  ;;  %v162_v31 = vld [vmem:[#allocation2 + $0x360] sm:$0xff]  ;;  %v179_v32 = vld [vmem:[#allocation2 + $0x3e8] sm:$0xff] }
  0x56   :  { %515 = vmatpush.msra.mxu1 %v115_v33  ;;  %536 = vmatpush.msra.mxu2 %v130_v34  ;;  %v161_v33 = vld [vmem:[#allocation2 + $0x358] sm:$0xff]  ;;  %v178_v34 = vld [vmem:[#allocation2 + $0x3e0] sm:$0xff] }
  0x57   :  { %555 = vmatpush.msra.mxu3 %v147_v35  ;;  %428 = vmatmul.f32.vlgmr.msrb.gmra.mxu1 %v305_v12  ;;  %v87_v12 = vld [vmem:[#allocation2 + $0x108] sm:$0xff]  ;;  %v160_v35 = vld [vmem:[#allocation2 + $0x350] sm:$0xff] }
  0x58   :  { %497 = vmatpush.msra.mxu0 %v97_v36  ;;  %516 = vmatpush.msra.mxu1 %v114_v37  ;;  %v177_v36 = vld [vmem:[#allocation2 + $0x3d8] sm:$0xff]  ;;  %v159_v37 = vld [vmem:[#allocation2 + $0x348] sm:$0xff] }
  0x59   :  { %537 = vmatpush.msra.mxu2 %v129_v38  ;;  %556 = vmatpush.msra.mxu3 %v146_v39  ;;  %v176_v38 = vld [vmem:[#allocation2 + $0x3d0] sm:$0xff]  ;;  %v158_v39 = vld [vmem:[#allocation2 + $0x340] sm:$0xff] }
  0x5a   :  { %498 = vmatpush.msra.mxu0 %v96_v40  ;;  %517 = vmatpush.msra.mxu1 %v113_v41  ;;  %v175_v40 = vld [vmem:[#allocation2 + $0x3c8] sm:$0xff]  ;;  %v157_v41 = vld [vmem:[#allocation2 + $0x338] sm:$0xff] }
  0x5b   :  { %538 = vmatpush.msra.mxu2 %v128_v42  ;;  %557 = vmatpush.msra.mxu3 %v145_v43  ;;  %v174_v42 = vld [vmem:[#allocation2 + $0x3c0] sm:$0xff]  ;;  %v156_v43 = vld [vmem:[#allocation2 + $0x330] sm:$0xff] }
  0x5c   :  { %499 = vmatpush.msra.mxu0 %v95_v44  ;;  %518 = vmatpush.msra.mxu1 %v112_v45  ;;  %v173_v44 = vld [vmem:[#allocation2 + $0x3b8] sm:$0xff]  ;;  %v155_v45 = vld [vmem:[#allocation2 + $0x328] sm:$0xff] }
  0x5d   :  { %539 = vmatpush.msra.mxu2 %v127_v46  ;;  %558 = vmatpush.msra.mxu3 %v144_v47  ;;  %v172_v46 = vld [vmem:[#allocation2 + $0x3b0] sm:$0xff]  ;;  %v154_v47 = vld [vmem:[#allocation2 + $0x320] sm:$0xff] }
  0x5e   :  { %500 = vmatpush.msra.mxu0 %v94_v48  ;;  %519 = vmatpush.msra.mxu1 %v111_v49  ;;  %v171_v48 = vld [vmem:[#allocation2 + $0x3a8] sm:$0xff]  ;;  %v153_v49 = vld [vmem:[#allocation2 + $0x318] sm:$0xff] }
  0x5f   :  { %540 = vmatpush.msra.mxu2 %v126_v50  ;;  %559 = vmatpush.msra.mxu3 %v143_v51  ;;  %v170_v50 = vld [vmem:[#allocation2 + $0x3a0] sm:$0xff]  ;;  %v152_v51 = vld [vmem:[#allocation2 + $0x310] sm:$0xff] }
  0x60   :  { %501 = vmatpush.msra.mxu0 %v93_v52  ;;  %520 = vmatpush.msra.mxu1 %v110_v53  ;;  %v169_v52 = vld [vmem:[#allocation2 + $0x398] sm:$0xff]  ;;  %v151_v53 = vld [vmem:[#allocation2 + $0x308] sm:$0xff] }
  0x61   :  { %541 = vmatpush.msra.mxu2 %v125_v54  ;;  %560 = vmatpush.msra.mxu3 %v142_v55  ;;  %v168_v54 = vld [vmem:[#allocation2 + $0x390] sm:$0xff]  ;;  %v150_v55 = vld [vmem:[#allocation2 + $0x300] sm:$0xff] }
  0x62   :  { %502 = vmatpush.msra.mxu0 %v92_v56  ;;  %521 = vmatpush.msra.mxu1 %v109_v57  ;;  %v167_v56 = vld [vmem:[#allocation2 + $0x388] sm:$0xff] }
  0x63   :  { %542 = vmatpush.msra.mxu2 %v124_v58  ;;  %561 = vmatpush.msra.mxu3 %v141_v59  ;;  %v443_v57 = vld.sshfl [vmem:[#allocation1 + $0x30] sm:$0xff pattern:$0x73625140]  ;;  %v166_v58 = vld [vmem:[#allocation2 + $0x380] sm:$0xff] }
  0x64   :  { %503 = vmatpush.msra.mxu0 %v91_v60  ;;  %522 = vmatpush.msra.mxu1 %v108_v61  ;;  %v444_v59 = vld.sshfl [vmem:[#allocation1 + $0x38] sm:$0xff pattern:$0x73625140] }
  0x65   :  { %543 = vmatpush.msra.mxu2 %v123_v62  ;;  %562 = vmatpush.msra.mxu3 %v140_v63 }
  0x66   :  { %504 = vmatpush.msra.mxu0 %v90_v0  ;;  %523 = vmatpush.msra.mxu1 %v107_v1 }
  0x67   :  { %544 = vmatpush.msra.mxu2 %v122_v2  ;;  %563 = vmatpush.msra.mxu3 %v139_v3 }
  0x68   :  { %505 = vmatpush.msra.mxu0 %v89_v4  ;;  %524 = vmatpush.msra.mxu1 %v106_v5 }
  0x69   :  { %545 = vmatpush.msra.mxu2 %v121_v6  ;;  %564 = vmatpush.msra.mxu3 %v138_v7 }
  0x6a   :  { %506 = vmatpush.msra.mxu0 %v88_v8  ;;  %525 = vmatpush.msra.mxu1 %v105_v9 }
  0x6b   :  { %546 = vmatpush.msra.mxu2 %v120_v10  ;;  %565 = vmatpush.msra.mxu3 %v137_v11 }
  0x6c   :  { %507 = vmatpush.msra.mxu0 %v87_v12  ;;  %526 = vmatpush.msra.mxu1 %v104_v13 }
  0x6d   :  { %547 = vmatpush.msra.mxu2 %v119_v14  ;;  %566 = vmatpush.msra.mxu3 %v136_v15 }
  0x6e   :  { %508 = vmatpush.msra.mxu0 %v86_v16  ;;  %527 = vmatpush.msra.mxu1 %v103_v17 }
  0x6f   :  { %548 = vmatpush.msra.mxu2 %v118_v18  ;;  %567 = vmatpush.msra.mxu3 %v135_v19 }
  0x70   :  { %509 = vmatmul.f32.vlgmr.msra.gmra.mxu0 %v439_v20  ;;  %549 = vmatmul.f32.vlgmr.msra.gmra.mxu2 %v441_v21  ;;  %v629_v21 = vld [vmem:[%s754_s4] ss:$0 sm:$0xff] }
  0x71   :  { %573 = vmatpush.msrb.mxu0 %v165_v22  ;;  %528 = vmatpush.msra.mxu1 %v102_v23 }
  0x72   :  { %568 = vmatpush.msra.mxu3 %v134_v24  ;;  %529 = vmatmul.f32.vlgmr.msra.gmra.mxu1 %v440_v25 }
  0x73   :  { %569 = vmatmul.f32.vlgmr.msra.gmra.mxu3 %v442_v26  ;;  %574 = vmatpush.msrb.mxu0 %v164_v27 }
  0x74   :  { %593 = vmatpush.msrb.mxu1 %v181_v28 }
  0x75   :  { %575 = vmatpush.msrb.mxu0 %v163_v29 }
  0x76   :  { %594 = vmatpush.msrb.mxu1 %v180_v30 }
  0x77   :  { %576 = vmatpush.msrb.mxu0 %v162_v31 }
  0x78   :  { %595 = vmatpush.msrb.mxu1 %v179_v32 }
  0x79   :  { %577 = vmatpush.msrb.mxu0 %v161_v33 }
  0x7a   :  { %596 = vmatpush.msrb.mxu1 %v178_v34 }
  0x7b   :  { %578 = vmatpush.msrb.mxu0 %v160_v35 }
  0x7c   :  { %597 = vmatpush.msrb.mxu1 %v177_v36 }
  0x7d   :  { %579 = vmatpush.msrb.mxu0 %v159_v37 }
  0x7e   :  { %598 = vmatpush.msrb.mxu1 %v176_v38 }
  0x7f   :  { %580 = vmatpush.msrb.mxu0 %v158_v39 }
  0x80   :  { %599 = vmatpush.msrb.mxu1 %v175_v40 }
  0x81   :  { %581 = vmatpush.msrb.mxu0 %v157_v41 }
  0x82   :  { %600 = vmatpush.msrb.mxu1 %v174_v42 }
  0x83   :  { %582 = vmatpush.msrb.mxu0 %v156_v43 }
  0x84   :  { %601 = vmatpush.msrb.mxu1 %v173_v44 }
  0x85   :  { %583 = vmatpush.msrb.mxu0 %v155_v45 }
  0x86   :  { %602 = vmatpush.msrb.mxu1 %v172_v46 }
  0x87   :  { %584 = vmatpush.msrb.mxu0 %v154_v47 }
  0x88   :  { %603 = vmatpush.msrb.mxu1 %v171_v48 }
  0x89   :  { %585 = vmatpush.msrb.mxu0 %v153_v49 }
  0x8a   :  { %604 = vmatpush.msrb.mxu1 %v170_v50 }
  0x8b   :  { %586 = vmatpush.msrb.mxu0 %v152_v51 }
  0x8c   :  { %605 = vmatpush.msrb.mxu1 %v169_v52 }
  0x8d   :  { %587 = vmatpush.msrb.mxu0 %v151_v53 }
  0x8e   :  { %606 = vmatpush.msrb.mxu1 %v168_v54 }
  0x8f   :  { %588 = vmatpush.msrb.mxu0 %v150_v55 }
  0x90   :  { %607 = vmatpush.msrb.mxu1 %v167_v56  ;;  %589 = vmatmul.f32.vlgmr.msrb.gmra.mxu0 %v443_v57 }
  0x92   :  { %608 = vmatpush.msrb.mxu1 %v166_v58 }
  0x93   :  { %609 = vmatmul.f32.vlgmr.msrb.gmra.mxu1 %v444_v59 }
  0xc7   :  { %v329_v61 = vpop.f32.mrf.mxu0 }
  0xca   :  { %v349_v60 = vpop.f32.mrf.mxu1 }
  0xcb   :  { %v350_v62 = vadd.f32 %v349_v60, %v329_v61  ;;  %v369_v63 = vpop.f32.mrf.mxu2 }
  0xcd   :  { %v370_v0 = vadd.f32 %v369_v63, %v350_v62 }
  0xce   :  { %v389_v1 = vpop.f32.mrf.mxu3 }
  0xcf   :  { %v390_v2 = vadd.f32 %v389_v1, %v370_v0 }
  0xd1   :  { %v409_v3 = vpop.f32.mrf.mxu0 }
  0xd2   :  { %v410_v4 = vadd.f32 %v409_v3, %v390_v2 }
  0xd4   :  { %v429_v5 = vpop.f32.mrf.mxu1 }
  0xd5   :  { %v430_v6 = vadd.f32 %v429_v5, %v410_v4  ;;  %v470_v7 = vpop.f32.mrf.mxu2 }
  0xd7   :  { %v471_v8 = vadd.f32 %v470_v7, %v430_v6 }
  0xd8   :  { %v490_v9 = vpop.f32.mrf.mxu3 }
  0xd9   :  { %v491_v11 = vadd.f32 %v490_v9, %v471_v8 }
  0xed   :  { %v510_v10 = vpop.f32.mrf.mxu0 }
  0xee   :  { %v511_v12 = vadd.f32 %v510_v10, %v491_v11 }
  0xef   :  { %v530_v13 = vpop.f32.mrf.mxu1 }
  0xf0   :  { %v531_v15 = vadd.f32 %v530_v13, %v511_v12 }
  0xf3   :  { %v550_v14 = vpop.f32.mrf.mxu2 }
  0xf4   :  { %v551_v16 = vadd.f32 %v550_v14, %v531_v15 }
  0xf6   :  { %v570_v17 = vpop.f32.mrf.mxu3 }
  0xf7   :  { %v571_v18 = vadd.f32 %v570_v17, %v551_v16 }
 0x10d   :  { %v590_v19 = vpop.f32.mrf.mxu0 }
 0x10e   :  { %v591_v20 = vadd.f32 %v590_v19, %v571_v18 }
 0x110   :  { %v610_v22 = vpop.f32.mrf.mxu1 }
 0x111   :  { %v611_v23 = vadd.f32 %v610_v22, %v591_v20 }
 0x113   :  { %v617_v24 = vadd.f32 %v629_v21, %v611_v23 }
 0x115   :  { %618 = vst [vmem:[%s755_s5] sm:$0x3] %v617_v24 }
 0x116   :  { %623 = vsyncpa [#allocation3], 1 }
 0x117   :  { %624 = vsyncpa [#allocation5], 1 }

</bundles_post_ra>
